<compile_context>
chip_gen: v7x
topology: tpu7x:2x2x1
jax: 0.10.0
libtpu: 0.0.40
codegen_flags: <defaults>
</compile_context>

<pallas_src>
import functools

import jax
import jax.numpy as jnp
from jax.experimental import pallas as pl
from jax.experimental.pallas import tpu as pltpu


def _round_up(x, m):
    return ((x + m - 1) // m) * m


def _pick_tile(padded_size, candidates):
    """Largest candidate tile that evenly divides padded_size."""
    for c in candidates:
        if padded_size % c == 0:
            return c
    return padded_size


def _foot_contact_kernel(ids_ref, y_ref, o_ref, *, rho_sq, use_approx_reciprocal):
    """Computes one (TB, TN) output tile.

    ids_ref: (1, TN)     int32  foot-contact vertex ids for this lane tile
    y_ref:   (TB, V_pad) f32    y-coordinate of every vertex, this batch tile
    o_ref:   (TB, TN)    f32    GMoF_unscaled(vertices[:, ids, 1])
    """
    v_pad = y_ref.shape[1]
    tn = o_ref.shape[1]

    # Fused gather: one-hot selection (VPU) + matmul (MXU, fp32 precision).
    ids_row = ids_ref[...]                                          # (1, TN)
    v_iota = jax.lax.broadcasted_iota(jnp.int32, (v_pad, tn), 0)    # (V_pad, TN)
    onehot = jnp.where(v_iota == ids_row, 1.0, 0.0).astype(jnp.float32)
    y_sel = jnp.dot(
        y_ref[...], onehot,
        preferred_element_type=jnp.float32,
        precision=jax.lax.Precision.HIGHEST,                        # exact selection
    )                                                               # (TB, TN)

    # GMoF_unscaled robustifier.
    sq = y_sel * y_sel
    denom = sq + rho_sq
    if use_approx_reciprocal:
        # EUP vrcp (own VLIW slot, ~free) -- loosens accuracy to ~1e-3 rel.
        o_ref[...] = sq * pl.reciprocal(denom, approx=True)
    else:
        o_ref[...] = sq / denom


def foot_contact_loss(vertices, foot_contact_verts_ids, rho_contact,
                      *, use_approx_reciprocal=False):
    """vertices: (B, V, 3) f32; foot_contact_verts_ids: (N,) int.

    Returns foot_dist: (B, N) f32, identical to FootoContactLoss.forward.
    """
    vertices = jnp.asarray(vertices, jnp.float32)
    ids = jnp.asarray(foot_contact_verts_ids, jnp.int32).reshape(-1)

    B, V, _ = vertices.shape
    N = ids.shape[0]

    # Glue: strided slice of the y-plane (fuses with the producer of
    # `vertices` in XLA; no gathered (B, N) intermediate hits HBM).
    y = vertices[:, :, 1]                                           # (B, V)

    # Lane/sublane-dense padding: sublanes (B) -> x8, lanes (V, N) -> x128.
    B_pad = _round_up(B, 8)
    V_pad = _round_up(V, 128)
    N_pad = _round_up(N, 128)

    y_pad = jnp.pad(y, ((0, B_pad - B), (0, V_pad - V)))
    ids_pad = jnp.pad(ids, (0, N_pad - N)).reshape(1, N_pad)        # pad ids -> vertex 0

    # Tile sizes. Per-block VMEM ~ 2*TB*V_pad*4 + 2*TB*TN*4 + V_pad*TN*4;
    # with TB<=32, TN<=256, V_pad~10.5k (SMPL-X) this is < ~14 MiB: fits
    # v5e's 16 MiB scoped default and easily v6e/v7x's 32 MiB.
    TB = _pick_tile(B_pad, (32, 16, 8))
    TN = _pick_tile(N_pad, (256, 128))

    grid = (B_pad // TB, N_pad // TN)

    kernel = functools.partial(
        _foot_contact_kernel,
        rho_sq=float(rho_contact) ** 2,
        use_approx_reciprocal=use_approx_reciprocal,
    )

    out_pad = pl.pallas_call(
        kernel,
        out_shape=jax.ShapeDtypeStruct((B_pad, N_pad), jnp.float32),
        grid_spec=pltpu.PrefetchScalarGridSpec(
            num_scalar_prefetch=0,
            grid=grid,
            in_specs=[
                pl.BlockSpec((1, TN), lambda i, j: (0, j)),         # ids row tile
                pl.BlockSpec((TB, V_pad), lambda i, j: (i, 0)),     # y-plane batch tile
            ],
            out_specs=pl.BlockSpec((TB, TN), lambda i, j: (i, j)),
        ),
        compiler_params=pltpu.CompilerParams(
            # Both grid axes independent -> megacore-shardable on v7x.
            dimension_semantics=("parallel", "parallel"),
            vmem_limit_bytes=32 * 1024 * 1024,
        ),
    )(ids_pad, y_pad)

    return out_pad[:B, :N]


def _reference(vertices, ids, rho_contact):
    y = vertices[:, ids, 1]
    sq = y ** 2
    return sq / (sq + rho_contact ** 2)


if __name__ == "__main__":
    key = jax.random.PRNGKey(0)
    B, V, N = 2, 64, 16
    rho_contact = 1.0  # GMoF rho

    k_v, k_i = jax.random.split(key)
    vertices = jax.random.normal(k_v, (B, V, 3), dtype=jnp.float32)
    # Deterministic synthetic foot-contact vertex ids (stand-in for L_Leg/R_Leg json).
    foot_contact_verts_ids = jax.random.permutation(k_i, V)[:N].astype(jnp.int32)

    out = foot_contact_loss(vertices, foot_contact_verts_ids, rho_contact)
    out = jax.block_until_ready(out)

    ref = _reference(vertices, foot_contact_verts_ids, rho_contact)
    assert out.shape == (B, N)
    assert jnp.allclose(out, ref, atol=1e-6, rtol=1e-5), float(
        jnp.max(jnp.abs(out - ref)))

    print("KERNEL_OK")
</pallas_src>

<mosaic_0001>
module attributes {stable_mosaic.version = 11 : i64} {
  func.func @_foot_contact_kernel(%arg0: i32, %arg1: i32, %arg2: memref<1x128xi32, #tpu.memory_space<vmem>>, %arg3: memref<8x128xf32, #tpu.memory_space<vmem>>, %arg4: memref<8x128xf32, #tpu.memory_space<vmem>>) attributes {dimension_semantics = [#tpu.dimension_semantics<parallel>, #tpu.dimension_semantics<parallel>], iteration_bounds = array<i64: 1, 1>, scalar_prefetch = 0 : i64, scratch_operands = 0 : i64, tpu.core_type = #tpu.core_type<tc>, window_params = [{transform_indices = @transform_0, window_bounds = array<i64: 1, 128>}, {transform_indices = @transform_1, window_bounds = array<i64: 8, 128>}, {transform_indices = @transform_2, window_bounds = array<i64: 8, 128>}]} {
    %c0 = arith.constant 0 : index
    %c0_0 = arith.constant 0 : index
    %0 = vector.load %arg2[%c0, %c0_0] : memref<1x128xi32, #tpu.memory_space<vmem>>, vector<1x128xi32>
    %1 = tpu.iota {dimensions = array<i32: 0>} : vector<128x128xi32>
    %2 = vector.broadcast %0 : vector<1x128xi32> to vector<128x128xi32>
    %3 = arith.cmpi eq, %1, %2 : vector<128x128xi32>
    %cst = arith.constant 1.000000e+00 : f32
    %cst_1 = arith.constant 0.000000e+00 : f32
    %4 = vector.broadcast %cst : f32 to vector<128x128xf32>
    %5 = vector.broadcast %cst_1 : f32 to vector<128x128xf32>
    %6 = arith.select %3, %4, %5 : vector<128x128xi1>, vector<128x128xf32>
    %c0_2 = arith.constant 0 : index
    %c0_3 = arith.constant 0 : index
    %7 = vector.load %arg3[%c0_2, %c0_3] : memref<8x128xf32, #tpu.memory_space<vmem>>, vector<8x128xf32>
    %cst_4 = arith.constant dense<0.000000e+00> : vector<8x128xf32>
    %8 = tpu.matmul %7, %6, %cst_4 {dimension_numbers = #tpu.dot_dimension_numbers<[1], [0], [0], [1], [0, 0, 1, 1], [], []>, precision = #tpu.contract_precision<fp32>} : vector<8x128xf32>, vector<128x128xf32>, vector<8x128xf32> -> vector<8x128xf32>
    %9 = arith.mulf %8, %8 : vector<8x128xf32>
    %cst_5 = arith.constant 1.000000e+00 : f32
    %10 = vector.broadcast %cst_5 : f32 to vector<8x128xf32>
    %11 = arith.addf %9, %10 : vector<8x128xf32>
    %12 = arith.divf %9, %11 : vector<8x128xf32>
    %c0_6 = arith.constant 0 : index
    %c0_7 = arith.constant 0 : index
    %13 = vector.load %arg4[%c0_6, %c0_7] : memref<8x128xf32, #tpu.memory_space<vmem>>, vector<8x128xf32>
    tpu.vector_store %arg4[%c0_6, %c0_7], %12 {strides = array<i32>} : memref<8x128xf32, #tpu.memory_space<vmem>>, vector<8x128xf32>,
    return
  }
  func.func @transform_0(%arg0: i32, %arg1: i32) -> (i32, i32) {
    %c0_i32 = arith.constant 0 : i32
    %c0_i32_0 = arith.constant 0 : i32
    return %c0_i32, %arg1 : i32, i32
  }
  func.func @transform_1(%arg0: i32, %arg1: i32) -> (i32, i32) {
    %c0_i32 = arith.constant 0 : i32
    %c0_i32_0 = arith.constant 0 : i32
    return %arg0, %c0_i32 : i32, i32
  }
  func.func @transform_2(%arg0: i32, %arg1: i32) -> (i32, i32) {
    %c0_i32 = arith.constant 0 : i32
    return %arg0, %arg1 : i32, i32
  }
}

</mosaic_0001>

<bundles_post_ra>
// kernel: tpu_custom_call.1
= control target key start
LH: loop header
LB: loop body
LE: loop exit
PB: predicated region body
PF: predicated region fallthrough
CT: control target
= control target key end

     0   :  { %7 = vsyncpa [#allocation3], 0  ;;  %s1723_s0 = inlined_call_operand.hbm [shape: s32[1,128], index: 0, kind: input, shape index: {}]   ;;  %s1724_s1 = inlined_call_operand.hbm [shape: f32[8,128], index: 1, kind: input, shape index: {}]   ;;  %s1725_s2 = inlined_call_operand.hbm [shape: f32[8,128], index: 2, kind: output, shape index: {}]  }
   0x1   :  { %8 = vsyncpa [#allocation6], 0 }
   0x2   :  { %9 = vsyncpa [#allocation4], 0  ;;  %s1252_s9 = smov [#allocation2]   ;;  %s1253_s11 = smov [#allocation5]  }
   0x3   :  { %s16_s10 = sshll.u32 %s1252_s9, 4  ;;  %s26_s12 = sshll.u32 %s1253_s11, 4  ;;  %s17_s10 = int_to_ptr.vmem [resolvable:$true] %s16_s10  ;;  %s27_s12 = int_to_ptr.vmem [resolvable:$true] %s26_s12 }
   0x4   :  { %s1180_s15 = scalar_lea.hbm %s1723_s0, 16 }
   0x5   :  { %p1181_p0 = scmp.ne.s32.totalorder %s1723_s0, %s1180_s15  ;;  %p1184_p1 = scmp.lt.u32.totalorder %s1180_s15, %s1723_s0 }
   0x7   :  { %p1186_p2 = pnand %p1184_p1, %p1181_p0 }
   0x9   :  { %1189 = shalt.err (!%p1186_p2)
}
   0xa   :  { %s1190_s20 = scalar_lea.vmem %s17_s10, 16  ;;  %s1194_s21 = scalar_lea.vmem %s17_s10, 32 }
   0xb   :  { %p1191_p3 = scmp.ne.s32.totalorder %s17_s10, %s1190_s20  ;;  %p1195_p4 = scmp.lt.s32.totalorder %s17_s10, %s17_s10 }
   0xc   :  { %p1196_p5 = scmp.lt.s32.totalorder %s1194_s21, %s1190_s20 }
   0xe   :  { %p1197_p6 = por %p1196_p5, %p1195_p4 }
  0x10   :  { %p1198_p7 = pnand %p1197_p6, %p1191_p3 }
  0x12   :  { %1201 = shalt.err (!%p1198_p7)
}
  0x13   :  { %19 = dma.hbm_to_vmem [thread:$0]  %s1723_s0, 16, %s17_s10, [#allocation3]  }
  0x14   :  { %s1202_s26 = scalar_lea.hbm %s1724_s1, 128 }
  0x15   :  { %p1203_p8 = scmp.ne.s32.totalorder %s1724_s1, %s1202_s26  ;;  %p1206_p9 = scmp.lt.u32.totalorder %s1202_s26, %s1724_s1 }
  0x17   :  { %p1208_p10 = pnand %p1206_p9, %p1203_p8 }
  0x19   :  { %1211 = shalt.err (!%p1208_p10)
}
  0x1a   :  { %s1212_s3 = scalar_lea.vmem %s27_s12, 128  ;;  %p1217_p12 = scmp.lt.s32.totalorder %s27_s12, %s27_s12 }
  0x1b   :  { %p1213_p11 = scmp.ne.s32.totalorder %s27_s12, %s1212_s3  ;;  %p1218_p13 = scmp.lt.s32.totalorder %s1212_s3, %s1212_s3 }
  0x1d   :  { %p1219_p0 = por %p1218_p13, %p1217_p12 }
  0x1f   :  { %p1220_p1 = pnand %p1219_p0, %p1213_p11 }
  0x21   :  { %1223 = shalt.err (!%p1220_p1)
}
  0x22   :  { %29 = dma.hbm_to_vmem [thread:$0]  %s1724_s1, 128, %s27_s12, [#allocation6]  }
  0x23   :  { %1246 = dma.done.wait [#allocation3], 16  }
  0x24   :  { %1247 = vsyncadd [#allocation3], 4294967280 }
  0x25   :  { %1248 = dma.done.wait [#allocation6], 128  }
  0x26   :  { %1249 = vsyncadd [#allocation6], 4294967168  ;;  %v37_v0 = vlaneseq  ;;  %v1254_v1 = vmov 0.0|0.0   ;;  %vm1255_vm0 = vmmov 0   ;;  %v1256_v3 = vmov 0.0   ;;  %v90_v20 = vld [vmem:[#allocation5] sm:$0xff] }
  0x27   :  { %1018 = vmatprep.subr.bf16.mxu1 %v1254_v1  ;;  %1090 = vmatprep.subr.bf16.mxu0 %v1254_v1  ;;  %v1309_v7 = vld [vmem:[#allocation2] ss:$0 sm:$0xff]  ;;  %v1257_v11 = vmov 1.0|1.0   ;;  %v1408_v26 = vand.u32 4294901760, %v90_v20  ;;  %s1258_s1 = smov [#allocation7]  }
  0x28   :  { %v1300_v2 = vshrl.u32 %v37_v0, 7  ;;  %840 = vmatprep.mubr.msk.f32.mxu1 %vm1255_vm0, %v1256_v3  ;;  %945 = vmatprep.mubr.msk.f32.mxu0 %vm1255_vm0, %v1256_v3  ;;  %s647_s5 = sshll.u32 %s1258_s1, 4  ;;  %s648_s5 = int_to_ptr.vmem [resolvable:$true] %s647_s5 }
  0x29   :  { %v1447_v34 = vsub.f32 %v90_v20, %v1408_v26  ;;  %s1224_s6 = scalar_lea.vmem %s648_s5, 128  ;;  %p1229_p3 = scmp.lt.s32.totalorder %s648_s5, %s648_s5 }
  0x2a   :  { %v39_v4 = vadd.s32 8, %v1300_v2  ;;  %v40_v5 = vadd.s32 16, %v1300_v2  ;;  %v41_v6 = vadd.s32 24, %v1300_v2  ;;  %v42_v8 = vadd.s32 32, %v1300_v2  ;;  %p1225_p2 = scmp.ne.s32.totalorder %s648_s5, %s1224_s6  ;;  %p1230_p4 = scmp.lt.s32.totalorder %s1224_s6, %s1224_s6 }
  0x2b   :  { %v43_v9 = vadd.s32 40, %v1300_v2  ;;  %vm58_vm1 = vcmp.eq.s32.totalorder %v1300_v2, %v1309_v7  ;;  %v44_v13 = vadd.s32 48, %v1300_v2  ;;  %v45_v14 = vadd.s32 56, %v1300_v2 }
  0x2c   :  { %vm59_vm2 = vcmp.eq.s32.totalorder %v39_v4, %v1309_v7  ;;  %vm60_vm3 = vcmp.eq.s32.totalorder %v40_v5, %v1309_v7  ;;  %vm61_vm4 = vcmp.eq.s32.totalorder %v41_v6, %v1309_v7  ;;  %vm62_vm7 = vcmp.eq.s32.totalorder %v42_v8, %v1309_v7  ;;  %p1231_p5 = por %p1230_p4, %p1229_p3 }
  0x2d   :  { %vm1323_vm5 = vmpackc.low %vm59_vm2, %vm58_vm1  ;;  %vm63_vm8 = vcmp.eq.s32.totalorder %v43_v9, %v1309_v7  ;;  %vm64_vm10 = vcmp.eq.s32.totalorder %v44_v13, %v1309_v7  ;;  %vm65_vm11 = vcmp.eq.s32.totalorder %v45_v14, %v1309_v7  ;;  %v1366_v16 = vadd.s32 64, %v1300_v2 }
  0x2e   :  { %1020 = vmatpush3.bf16.msk.msra.mxu1 %vm1323_vm5, %v1257_v11  ;;  %1092 = vmatpush3.bf16.msk.msra.mxu0 %vm1323_vm5, %v1257_v11  ;;  %vm1339_vm6 = vmpackc.low %vm61_vm4, %vm60_vm3  ;;  %v1369_v17 = vadd.s32 72, %v1300_v2  ;;  %v74_v18 = vsel %vm58_vm1, 1.0, %v1256_v3  ;;  %v75_v19 = vsel %vm59_vm2, 1.0, %v1256_v3  ;;  %v1395_v22 = vadd.s32 80, %v1300_v2  ;;  %p1232_p6 = pnand %p1231_p5, %p1225_p2 }
  0x2f   :  { %1021 = vmatprep.subr.bf16.mxu1 %v1254_v1  ;;  %1093 = vmatprep.subr.bf16.mxu0 %v1254_v1  ;;  %vm1359_vm9 = vmpackc.low %vm63_vm8, %vm62_vm7  ;;  %v1397_v23 = vsub.f32 %v74_v18, %v74_v18  ;;  %vm66_vm13 = vcmp.eq.s32.totalorder %v1366_v16, %v1309_v7  ;;  %v1404_v24 = vadd.s32 88, %v1300_v2  ;;  %v1406_v25 = vsub.f32 %v75_v19, %v75_v19 }
  0x30   :  { %vm1390_vm12 = vmpackc.low %vm65_vm11, %vm64_vm10  ;;  %vm67_vm14 = vcmp.eq.s32.totalorder %v1369_v17, %v1309_v7  ;;  %v76_v27 = vsel %vm60_vm3, 1.0, %v1256_v3  ;;  %v77_v28 = vsel %vm61_vm4, 1.0, %v1256_v3  ;;  %v1435_v30 = vadd.s32 96, %v1300_v2 }
  0x31   :  { %vm1430_vm15 = vmpackc.low %vm67_vm14, %vm66_vm13  ;;  %v168_v31 = vand.u32 4294901760, %v1397_v23  ;;  %vm68_vm1 = vcmp.eq.s32.totalorder %v1395_v22, %v1309_v7  ;;  %vm69_vm2 = vcmp.eq.s32.totalorder %v1404_v24, %v1309_v7  ;;  %v1443_v32 = vadd.s32 104, %v1300_v2 }
  0x32   :  { %1023 = vmatpush3.bf16.msk.msra.mxu1 %vm1339_vm6, %v1257_v11  ;;  %1095 = vmatpush3.bf16.msk.msra.mxu0 %vm1339_vm6, %v1257_v11  ;;  %v174_v33 = vand.u32 4294901760, %v1406_v25  ;;  %v1449_v35 = vsub.f32 %v76_v27, %v76_v27  ;;  %v1451_v36 = vsub.f32 %v77_v28, %v77_v28  ;;  %v78_v37 = vsel %vm62_vm7, 1.0, %v1256_v3  ;;  %vm1473_vm3 = vmpackc.low %vm69_vm2, %vm68_vm1 }
  0x33   :  { %1024 = vmatprep.subr.bf16.mxu1 %v1254_v1  ;;  %1096 = vmatprep.subr.bf16.mxu0 %v1254_v1  ;;  %v79_v38 = vsel %vm63_vm8, 1.0, %v1256_v3  ;;  %v1478_v40 = vadd.s32 112, %v1300_v2  ;;  %v1481_v41 = vadd.s32 120, %v1300_v2  ;;  %v169_v42 = vsub.f32 %v1397_v23, %v168_v31 }
  0x34   :  { %v80_v43 = vsel %vm64_vm10, 1.0, %v1256_v3  ;;  %vm70_vm4 = vcmp.eq.s32.totalorder %v1435_v30, %v1309_v7  ;;  %vm71_vm7 = vcmp.eq.s32.totalorder %v1443_v32, %v1309_v7  ;;  %v175_v44 = vsub.f32 %v1406_v25, %v174_v33 }
  0x35   :  { %v81_v45 = vsel %vm65_vm11, 1.0, %v1256_v3  ;;  %v158_v46 = vand.u32 4294901760, %v1447_v34  ;;  %v180_v47 = vand.u32 4294901760, %v1449_v35  ;;  %v186_v48 = vand.u32 4294901760, %v1451_v36  ;;  %vm1518_vm8 = vmpackc.low %vm71_vm7, %vm70_vm4 }
  0x36   :  { %1026 = vmatpush3.bf16.msk.msra.mxu1 %vm1359_vm9, %v1257_v11  ;;  %1098 = vmatpush3.bf16.msk.msra.mxu0 %vm1359_vm9, %v1257_v11  ;;  %v1498_v49 = vsub.f32 %v78_v37, %v78_v37  ;;  %v1500_v50 = vsub.f32 %v79_v38, %v79_v38  ;;  %v1508_v51 = vsub.f32 %v80_v43, %v80_v43  ;;  %v170_v53 = vand.u32 4294901760, %v169_v42 }
  0x37   :  { %1027 = vmatprep.subr.bf16.mxu1 %v1254_v1  ;;  %1099 = vmatprep.subr.bf16.mxu0 %v1254_v1  ;;  %v1522_v54 = vsub.f32 %v81_v45, %v81_v45  ;;  %vm72_vm10 = vcmp.eq.s32.totalorder %v1478_v40, %v1309_v7  ;;  %vm73_vm11 = vcmp.eq.s32.totalorder %v1481_v41, %v1309_v7  ;;  %v176_v55 = vand.u32 4294901760, %v175_v44 }
  0x38   :  { %v82_v56 = vsel %vm66_vm13, 1.0, %v1256_v3  ;;  %v83_v57 = vsel %vm67_vm14, 1.0, %v1256_v3  ;;  %v159_v58 = vsub.f32 %v1447_v34, %v158_v46  ;;  %v192_v59 = vand.u32 4294901760, %v1498_v49  ;;  %vm1556_vm13 = vmpackc.low %vm73_vm11, %vm72_vm10 }
  0x39   :  { %v198_v60 = vand.u32 4294901760, %v1500_v50  ;;  %v181_v61 = vsub.f32 %v1449_v35, %v180_v47  ;;  %v187_v62 = vsub.f32 %v1451_v36, %v186_v48  ;;  %v204_v63 = vand.u32 4294901760, %v1508_v51 }
  0x3a   :  { %1029 = vmatpush3.bf16.msk.msra.mxu1 %vm1390_vm12, %v1257_v11  ;;  %1101 = vmatpush3.bf16.msk.msra.mxu0 %vm1390_vm12, %v1257_v11  ;;  %v210_v2 = vand.u32 4294901760, %v1522_v54  ;;  %v1561_v4 = vsub.f32 %v82_v56, %v82_v56  ;;  %v1563_v5 = vsub.f32 %v83_v57, %v83_v57  ;;  %v84_v6 = vsel %vm68_vm1, 1.0, %v1256_v3 }
  0x3b   :  { %1030 = vmatprep.subr.bf16.mxu1 %v1254_v1  ;;  %1102 = vmatprep.subr.bf16.mxu0 %v1254_v1  ;;  %v85_v8 = vsel %vm69_vm2, 1.0, %v1256_v3  ;;  %v160_v9 = vand.u32 4294901760, %v159_v58  ;;  %v1043_v13 = vpack.c.bf16 %v176_v55, %v170_v53  ;;  %v1115_v14 = vpack.c.bf16 %v174_v33, %v168_v31 }
  0x3c   :  { %v182_v16 = vand.u32 4294901760, %v181_v61  ;;  %v188_v17 = vand.u32 4294901760, %v187_v62  ;;  %v193_v18 = vsub.f32 %v1498_v49, %v192_v59  ;;  %v199_v19 = vsub.f32 %v1500_v50, %v198_v60 }
  0x3d   :  { %v216_v20 = vand.u32 4294901760, %v1561_v4  ;;  %v222_v22 = vand.u32 4294901760, %v1563_v5  ;;  %v1585_v24 = vsub.f32 %v84_v6, %v84_v6  ;;  %v1587_v27 = vsub.f32 %v85_v8, %v85_v8 }
  0x3e   :  { %1032 = vmatpush3.bf16.msk.msra.mxu1 %vm1430_vm15, %v1257_v11  ;;  %1104 = vmatpush3.bf16.msk.msra.mxu0 %vm1430_vm15, %v1257_v11  ;;  %v86_v28 = vsel %vm70_vm4, 1.0, %v1256_v3  ;;  %v87_v31 = vsel %vm71_vm7, 1.0, %v1256_v3  ;;  %v1118_v33 = vpack.c.bf16 %v186_v48, %v180_v47  ;;  %v205_v37 = vsub.f32 %v1508_v51, %v204_v63 }
  0x3f   :  { %1033 = vmatprep.subr.bf16.mxu1 %v1254_v1  ;;  %1105 = vmatprep.subr.bf16.mxu0 %v1254_v1  ;;  %v1046_v38 = vpack.c.bf16 %v188_v17, %v182_v16  ;;  %v194_v42 = vand.u32 4294901760, %v193_v18  ;;  %v200_v43 = vand.u32 4294901760, %v199_v19  ;;  %v211_v44 = vsub.f32 %v1522_v54, %v210_v2 }
  0x40   :  { %v228_v30 = vand.u32 4294901760, %v1585_v24  ;;  %v234_v32 = vand.u32 4294901760, %v1587_v27  ;;  %v1603_v45 = vsub.f32 %v86_v28, %v86_v28  ;;  %v88_v47 = vsel %vm72_vm10, 1.0, %v1256_v3 }
  0x41   :  { %v89_v48 = vsel %vm73_vm11, 1.0, %v1256_v3  ;;  %v1121_v53 = vpack.c.bf16 %v198_v60, %v192_v59  ;;  %v217_v55 = vsub.f32 %v1561_v4, %v216_v20  ;;  %v1049_v56 = vpack.c.bf16 %v200_v43, %v194_v42 }
  0x42   :  { %1035 = vmatpush3.bf16.msk.msra.mxu1 %vm1473_vm3, %v1257_v11  ;;  %1107 = vmatpush3.bf16.msk.msra.mxu0 %vm1473_vm3, %v1257_v11  ;;  %v206_v57 = vand.u32 4294901760, %v205_v37  ;;  %v212_v58 = vand.u32 4294901760, %v211_v44  ;;  %v223_v61 = vsub.f32 %v1563_v5, %v222_v22  ;;  %v240_v40 = vand.u32 4294901760, %v1603_v45 }
  0x43   :  { %1036 = vmatprep.subr.bf16.mxu1 %v1254_v1  ;;  %1108 = vmatprep.subr.bf16.mxu0 %v1254_v1  ;;  %v1624_v62 = vsub.f32 %v88_v47, %v88_v47  ;;  %v1627_v41 = vsub.f32 %v89_v48, %v89_v48  ;;  %v1124_v59 = vpack.c.bf16 %v210_v2, %v204_v63  ;;  %v218_v60 = vand.u32 4294901760, %v217_v55 }
  0x44   :  { %v1052_v6 = vpack.c.bf16 %v212_v58, %v206_v57  ;;  %v224_v8 = vand.u32 4294901760, %v223_v61  ;;  %v1127_v17 = vpack.c.bf16 %v222_v22, %v216_v20  ;;  %v241_v63 = vsub.f32 %v1603_v45, %v240_v40 }
  0x45   :  { %v258_v16 = vand.u32 4294901760, %v1627_v41  ;;  %v1067_v48 = vpack.c.bf16 %v1406_v25, %v1397_v23  ;;  %v1073_v10 = vpack.c.bf16 %v1500_v50, %v1498_v49  ;;  %v1079_v12 = vpack.c.bf16 %v1563_v5, %v1561_v4 }
  0x46   :  { %1038 = vmatpush3.bf16.msk.msra.mxu1 %vm1518_vm8, %v1257_v11  ;;  %1110 = vmatpush3.bf16.msk.msra.mxu0 %vm1518_vm8, %v1257_v11  ;;  %v1055_v2 = vpack.c.bf16 %v224_v8, %v218_v60  ;;  %v242_v20 = vand.u32 4294901760, %v241_v63  ;;  %v1082_v15 = vpack.c.bf16 %v1587_v27, %v1585_v24  ;;  %v1088_v23 = vpack.c.bf16 %v1627_v41, %v1624_v62 }
  0x47   :  { %1039 = vmatprep.subr.bf16.mxu1 %v1254_v1  ;;  %1111 = vmatprep.subr.bf16.mxu0 %v1254_v1 }
  0x4a   :  { %1041 = vmatpush3.bf16.msk.msra.mxu1 %vm1556_vm13, %v1257_v11  ;;  %1113 = vmatpush3.bf16.msk.msra.mxu0 %vm1556_vm13, %v1257_v11 }
  0x4b   :  { %1042 = vmatprep.subr.bf16.mxu1 %v1254_v1  ;;  %1114 = vmatprep.subr.bf16.mxu0 %v1254_v1 }
  0x4d   :  { %841 = vmatmul.mubr.f32.vlgmr.msra.gmra.mrb[0].mxu1 %v160_v9  ;;  %946 = vmatmul.mubr.f32.vlgmr.msra.gmra.mrb[0].mxu0 %v158_v46  ;;  %v1605_v46 = vsub.f32 %v87_v31, %v87_v31  ;;  %v229_v9 = vsub.f32 %v1585_v24, %v228_v30  ;;  %v1130_v31 = vpack.c.bf16 %v234_v32, %v228_v30 }
  0x4e   :  { %1044 = vmatpush3.bf16.msra.mxu1 %v1043_v13  ;;  %1116 = vmatpush3.bf16.msra.mxu0 %v1115_v14  ;;  %v235_v13 = vsub.f32 %v1587_v27, %v234_v32  ;;  %v252_v14 = vand.u32 4294901760, %v1624_v62 }
  0x4f   :  { %1045 = vmatprep.subr.bf16.mxu1 %v1254_v1  ;;  %1117 = vmatprep.subr.bf16.mxu0 %v1254_v1  ;;  %v246_v7 = vand.u32 4294901760, %v1605_v46  ;;  %v230_v18 = vand.u32 4294901760, %v229_v9  ;;  %v1085_v21 = vpack.c.bf16 %v1605_v46, %v1603_v45 }
  0x50   :  { %875 = vmatprep.mubr.msk.f32.mxu1 %vm1255_vm0, %v1256_v3  ;;  %980 = vmatprep.mubr.msk.f32.mxu0 %vm1255_vm0, %v1256_v3  ;;  %v236_v19 = vand.u32 4294901760, %v235_v13  ;;  %v1136_v32 = vpack.c.bf16 %v258_v16, %v252_v14 }
  0x51   :  { %v247_v28 = vsub.f32 %v1605_v46, %v246_v7  ;;  %v1133_v43 = vpack.c.bf16 %v246_v7, %v240_v40 }
  0x52   :  { %1047 = vmatpush3.bf16.msra.mxu1 %v1046_v38  ;;  %1119 = vmatpush3.bf16.msra.mxu0 %v1118_v33  ;;  %v253_v33 = vsub.f32 %v1624_v62, %v252_v14  ;;  %v1058_v37 = vpack.c.bf16 %v236_v19, %v230_v18  ;;  %v259_v38 = vsub.f32 %v1627_v41, %v258_v16 }
  0x53   :  { %1048 = vmatprep.subr.bf16.mxu1 %v1254_v1  ;;  %1120 = vmatprep.subr.bf16.mxu0 %v1254_v1  ;;  %v248_v22 = vand.u32 4294901760, %v247_v28 }
  0x54   :  { %v254_v44 = vand.u32 4294901760, %v253_v33  ;;  %v260_v47 = vand.u32 4294901760, %v259_v38 }
  0x55   :  { %v1061_v42 = vpack.c.bf16 %v248_v22, %v242_v20 }
  0x56   :  { %1050 = vmatpush3.bf16.msra.mxu1 %v1049_v56  ;;  %1122 = vmatpush3.bf16.msra.mxu0 %v1121_v53  ;;  %v1064_v30 = vpack.c.bf16 %v260_v47, %v254_v44  ;;  %v1070_v53 = vpack.c.bf16 %v1451_v36, %v1449_v35 }
  0x57   :  { %1051 = vmatprep.subr.bf16.mxu1 %v1254_v1  ;;  %1123 = vmatprep.subr.bf16.mxu0 %v1254_v1 }
  0x5a   :  { %1053 = vmatpush3.bf16.msra.mxu1 %v1052_v6  ;;  %1125 = vmatpush3.bf16.msra.mxu0 %v1124_v59 }
  0x5b   :  { %1054 = vmatprep.subr.bf16.mxu1 %v1254_v1  ;;  %1126 = vmatprep.subr.bf16.mxu0 %v1254_v1 }
  0x5e   :  { %1056 = vmatpush3.bf16.msra.mxu1 %v1055_v2  ;;  %1128 = vmatpush3.bf16.msra.mxu0 %v1127_v17 }
  0x5f   :  { %1057 = vmatprep.subr.bf16.mxu1 %v1254_v1  ;;  %1129 = vmatprep.subr.bf16.mxu0 %v1254_v1 }
  0x62   :  { %1059 = vmatpush3.bf16.msra.mxu1 %v1058_v37  ;;  %1131 = vmatpush3.bf16.msra.mxu0 %v1130_v31 }
  0x63   :  { %1060 = vmatprep.subr.bf16.mxu1 %v1254_v1  ;;  %1132 = vmatprep.subr.bf16.mxu0 %v1254_v1 }
  0x66   :  { %1062 = vmatpush3.bf16.msra.mxu1 %v1061_v42  ;;  %1134 = vmatpush3.bf16.msra.mxu0 %v1133_v43 }
  0x67   :  { %1063 = vmatprep.subr.bf16.mxu1 %v1254_v1  ;;  %1135 = vmatprep.subr.bf16.mxu0 %v1254_v1 }
  0x6a   :  { %1065 = vmatpush3.bf16.msra.mxu1 %v1064_v30  ;;  %1137 = vmatpush3.bf16.msra.mxu0 %v1136_v32 }
  0x6b   :  { %1066 = vmatprep.subr.bf16.mxu1 %v1254_v1  ;;  %1138 = vmatprep.subr.bf16.mxu0 %v1254_v1 }
  0x6d   :  { %876 = vmatmul.mubr.f32.vlgmr.msra.gmra.mrb[0].mxu1 %v1408_v26  ;;  %981 = vmatmul.mubr.f32.vlgmr.msra.gmra.mrb[0].mxu0 %v1408_v26 }
  0x6e   :  { %1068 = vmatpush3.bf16.msra.mxu1 %v1067_v48  ;;  %1140 = vmatpush3.bf16.msk.msra.mxu0 %vm1323_vm5, %v1257_v11 }
  0x6f   :  { %1069 = vmatprep.subr.bf16.mxu1 %v1254_v1  ;;  %1141 = vmatprep.subr.bf16.mxu0 %v1254_v1 }
  0x70   :  { %910 = vmatprep.mubr.msk.f32.mxu1 %vm1255_vm0, %v1256_v3  ;;  %1015 = vmatprep.mubr.msk.f32.mxu0 %vm1255_vm0, %v1256_v3  ;;  %v1076_v3 = vpack.c.bf16 %v1522_v54, %v1508_v51 }
  0x72   :  { %1071 = vmatpush3.bf16.msra.mxu1 %v1070_v53  ;;  %1143 = vmatpush3.bf16.msk.msra.mxu0 %vm1339_vm6, %v1257_v11 }
  0x73   :  { %1072 = vmatprep.subr.bf16.mxu1 %v1254_v1  ;;  %1144 = vmatprep.subr.bf16.mxu0 %v1254_v1 }
  0x76   :  { %1074 = vmatpush3.bf16.msra.mxu1 %v1073_v10  ;;  %1146 = vmatpush3.bf16.msk.msra.mxu0 %vm1359_vm9, %v1257_v11 }
  0x77   :  { %1075 = vmatprep.subr.bf16.mxu1 %v1254_v1  ;;  %1147 = vmatprep.subr.bf16.mxu0 %v1254_v1 }
  0x7a   :  { %1077 = vmatpush3.bf16.msra.mxu1 %v1076_v3  ;;  %1149 = vmatpush3.bf16.msk.msra.mxu0 %vm1390_vm12, %v1257_v11 }
  0x7b   :  { %1078 = vmatprep.subr.bf16.mxu1 %v1254_v1  ;;  %1150 = vmatprep.subr.bf16.mxu0 %v1254_v1 }
  0x7e   :  { %1080 = vmatpush3.bf16.msra.mxu1 %v1079_v12  ;;  %1152 = vmatpush3.bf16.msk.msra.mxu0 %vm1430_vm15, %v1257_v11 }
  0x7f   :  { %1081 = vmatprep.subr.bf16.mxu1 %v1254_v1  ;;  %1153 = vmatprep.subr.bf16.mxu0 %v1254_v1 }
  0x82   :  { %1083 = vmatpush3.bf16.msra.mxu1 %v1082_v15  ;;  %1155 = vmatpush3.bf16.msk.msra.mxu0 %vm1473_vm3, %v1257_v11 }
  0x83   :  { %1084 = vmatprep.subr.bf16.mxu1 %v1254_v1  ;;  %1156 = vmatprep.subr.bf16.mxu0 %v1254_v1 }
  0x86   :  { %1086 = vmatpush3.bf16.msra.mxu1 %v1085_v21  ;;  %1158 = vmatpush3.bf16.msk.msra.mxu0 %vm1518_vm8, %v1257_v11 }
  0x87   :  { %1087 = vmatprep.subr.bf16.mxu1 %v1254_v1  ;;  %1159 = vmatprep.subr.bf16.mxu0 %v1254_v1 }
  0x8a   :  { %1089 = vmatpush3.bf16.msra.mxu1 %v1088_v23  ;;  %1161 = vmatpush3.bf16.msk.msra.mxu0 %vm1556_vm13, %v1257_v11 }
  0x8d   :  { %911 = vmatmul.mubr.f32.vlgmr.msra.gmra.mrb[0].mxu1 %v1447_v34  ;;  %1016 = vmatmul.mubr.f32.vlgmr.msra.gmra.mrb[0].mxu0 %v1408_v26 }
 0x160   :  { %v385_v25 = vpop.f32.mrb[0].mxu1  ;;  %v632_v29 = vpop.f32.mrb[0].mxu0 }
 0x161   :  { %v1162_v35 = vadd.f32 %v632_v29, %v385_v25  ;;  %v912_v36 = vpop.f32.mrb[1].mxu1  ;;  %v1017_v39 = vpop.f32.mrb[1].mxu0 }
 0x163   :  { %v636_v49 = vmul.f32 %v1162_v35, %v1162_v35 }
 0x165   :  { %v637_v50 = vadd.f32 1.0, %v636_v49 }
 0x167   :  { %1178 = vrcp.f32 %v637_v50 }
 0x171   :  { %v1179_v1 = vpop.eup %1178 }
 0x172   :  { %v639_v51 = vmul.f32 %v1179_v1, %v636_v49 }
 0x174   :  { %640 = vst [vmem:[#allocation7] sm:$0xff] %v639_v51 }
 0x175   :  { %1235 = shalt.err (!%p1232_p6)
}
 0x176   :  { %s1236_s9 = scalar_lea.hbm %s1725_s2, 128 }
 0x177   :  { %p1237_p7 = scmp.ne.s32.totalorder %s1725_s2, %s1236_s9  ;;  %p1240_p8 = scmp.lt.u32.totalorder %s1236_s9, %s1725_s2 }
 0x179   :  { %p1242_p9 = pnand %p1240_p8, %p1237_p7 }
 0x17b   :  { %1245 = shalt.err (!%p1242_p9)
}
 0x17c   :  { %650 = dma.vmem_to_hbm [thread:$0]  %s648_s5, 128, %s1725_s2, [#allocation4]  }
 0x17d   :  { %1250 = dma.done.wait [#allocation4], 128  }
 0x17e   :  { %1251 = vsyncadd [#allocation4], 4294967168 }
 0x17f   :  { %654 = vsyncpa [#allocation3], 1 }
 0x180   :  { %655 = vsyncpa [#allocation6], 1 }
 0x181   :  { %656 = vsyncpa [#allocation4], 1 }

</bundles_post_ra>
